<compile_context>
chip_gen: v7x
topology: tpu7x:2x2x1
jax: 0.10.0
libtpu: 0.0.40
codegen_flags: <defaults>
</compile_context>

<pallas_src>
import jax
import jax.numpy as jnp
from jax.experimental import pallas as pl
from jax.experimental.pallas import tpu as pltpu


def _round_up(x, m):
    return (x + m - 1) // m * m


def _make_mlp_kernel(num_layers, compute_dtype):
    """Fused (Linear -> ReLU) * (num_layers-1) -> Linear kernel."""

    def kernel(*refs):
        # refs = [x_ref, w0, b0, w1, b1, ..., w_last, b_last, out_ref]
        x_ref = refs[0]
        out_ref = refs[-1]
        h = x_ref[...].astype(compute_dtype)               # bf16 MXU input
        for i in range(num_layers):
            w = refs[1 + 2 * i][...]                       # bf16 [in, out]
            b = refs[2 + 2 * i][...]                       # f32  [1, out]
            acc = jnp.dot(h, w, preferred_element_type=jnp.float32) + b
            if i < num_layers - 1:
                h = jnp.maximum(acc, 0.0).astype(compute_dtype)  # ReLU, downcast at dot input only
            else:
                h = acc                                    # classifier output stays f32
        out_ref[...] = h.astype(out_ref.dtype)

    return kernel


def vanilla_mlp_forward(x, params, *, batch_tile=None, compute_dtype=jnp.bfloat16,
                        max_batch_tile=1024, x_buffers=2):
    """Fused Pallas forward pass of VanillaMLP.

    x:       [B, input_dim]
    params:  list of (W [in, out], b [1, out]) tuples; last one is classifier.
    """
    B, d_in = x.shape
    num_layers = len(params)
    out_dim = params[-1][0].shape[1]
    assert params[0][0].shape[0] == d_in

    cd = jnp.dtype(compute_dtype)
    out_dtype = x.dtype

    # Pad only the hidden (VMEM-internal) dims to lane multiples; keep the
    # HBM-touching input/output dims at their true widths.
    hidden_dims = [w.shape[1] for (w, _) in params[:-1]]
    pdims = [d_in] + [_round_up(h, 128) for h in hidden_dims] + [out_dim]

    # Sublane packing of the compute dtype (f32 -> 8, bf16 -> 16, 8-bit -> 32).
    sub = 8 * (4 // max(cd.itemsize, 1))

    # ---- batch tile ------------------------------------------------------
    if batch_tile is not None:
        tb = max(sub, _round_up(batch_tile, sub))
    else:
        tb = min(max_batch_tile, _round_up(B, sub))
        # Guarantee >= 2 grid steps when B allows it (megacore sharding on v7x;
        # negligible per-step overhead on single-TC v5e/v6e).
        if B > sub:
            tb = min(tb, _round_up(pl.cdiv(B, 2), sub))
        tb = max(tb, sub)

    # ---- VMEM capacity (real chip value, with headroom for Mosaic scratch) --
    try:
        vmem_cap = int(pltpu.get_tpu_info().vmem_capacity_bytes)
    except Exception:  # info query only; never masks kernel/build errors
        vmem_cap = 64 << 20
    vmem_cap = max(vmem_cap - (8 << 20), 32 << 20)

    # Resident weights are single-buffered: count them exactly once.
    weight_bytes = sum(pdims[i] * pdims[i + 1] * cd.itemsize + pdims[i + 1] * 4
                       for i in range(num_layers))

    def _budget(tb_):
        io = (x_buffers * tb_ * pdims[0] * cd.itemsize            # x tiles
              + 2 * tb_ * pdims[-1] * jnp.dtype(out_dtype).itemsize)  # out tiles
        act = 2 * tb_ * max(pdims) * 4                             # f32 working set
        return weight_bytes + io + act + (2 << 20)                 # Mosaic headroom

    # If the budget doesn't fit, shrink the batch tile (never the weight
    # buffering); weights themselves always stay single-buffered.
    while _budget(tb) > vmem_cap and tb > sub:
        tb = max(sub, _round_up(tb // 2, sub))
    vmem_limit = int(min(max(_budget(tb), 16 << 20), vmem_cap))

    b_pad = _round_up(B, tb)

    # ---- pad + cast operands ----------------------------------------------
    if b_pad == B:
        xp = x.astype(compute_dtype)
    else:
        xp = jnp.zeros((b_pad, d_in), compute_dtype).at[:B, :].set(
            x.astype(compute_dtype))

    flat_params = []
    for li, (w, b) in enumerate(params):
        di, do = pdims[li], pdims[li + 1]
        wp = jnp.zeros((di, do), compute_dtype).at[:w.shape[0], :w.shape[1]].set(
            w.astype(compute_dtype))
        bp = jnp.zeros((1, do), jnp.float32).at[:, :b.shape[1]].set(
            b.astype(jnp.float32).reshape(1, -1))
        flat_params.extend([wp, bp])

    # ---- specs -------------------------------------------------------------
    x_kwargs = {} if x_buffers == 2 else {"pipeline_mode": pl.Buffered(x_buffers)}
    in_specs = [pl.BlockSpec((tb, pdims[0]), lambda i: (i, 0), **x_kwargs)]
    for li in range(num_layers):
        di, do = pdims[li], pdims[li + 1]
        # Constant index_map -> weights/biases fully resident in VMEM;
        # single-buffer them so they don't burn 2x VMEM.
        in_specs.append(pl.BlockSpec((di, do), lambda i: (0, 0),
                                     pipeline_mode=pl.Buffered(1)))
        in_specs.append(pl.BlockSpec((1, do), lambda i: (0, 0),
                                     pipeline_mode=pl.Buffered(1)))
    # True (unpadded) output width -> no inflated HBM writeback.
    out_specs = pl.BlockSpec((tb, out_dim), lambda i: (i, 0))

    kernel = _make_mlp_kernel(num_layers, compute_dtype)
    out_padded = pl.pallas_call(
        kernel,
        out_shape=jax.ShapeDtypeStruct((b_pad, out_dim), out_dtype),
        grid=(b_pad // tb,),
        in_specs=in_specs,
        out_specs=out_specs,
        compiler_params=pltpu.CompilerParams(
            dimension_semantics=("parallel",),   # batch shards across TCs on v7x
            vmem_limit_bytes=vmem_limit),
    )(xp, *flat_params)

    return out_padded[:B] if b_pad != B else out_padded


def init_mlp_params(key, input_dim, output_dim, hidden_dims):
    """Deterministic PyTorch-style (U[-1/sqrt(fan_in), 1/sqrt(fan_in)]) init."""
    dims = [input_dim] + list(hidden_dims) + [output_dim]
    params = []
    for d_i, d_o in zip(dims[:-1], dims[1:]):
        key, kw, kb = jax.random.split(key, 3)
        bound = 1.0 / jnp.sqrt(jnp.float32(d_i))
        w = jax.random.uniform(kw, (d_i, d_o), jnp.float32, -bound, bound)
        b = jax.random.uniform(kb, (1, d_o), jnp.float32, -bound, bound)
        params.append((w, b))
    return params


def reference_forward(x, params, compute_dtype=jnp.bfloat16):
    """Pure-JAX reference matching the kernel's precision recipe."""
    h = x.astype(compute_dtype)
    for i, (w, b) in enumerate(params):
        acc = jnp.dot(h, w.astype(compute_dtype),
                      preferred_element_type=jnp.float32) + b
        if i < len(params) - 1:
            acc = jnp.maximum(acc, 0.0)
            h = acc.astype(compute_dtype)
        else:
            h = acc
    return h.astype(x.dtype)


if __name__ == "__main__":
    key = jax.random.PRNGKey(0)
    kx, kp = jax.random.split(key)

    batch = 8
    input_dim = 16
    hidden_dims = [32, 64]
    output_dim = 8

    x = jax.random.normal(kx, (batch, input_dim), jnp.float32)
    params = init_mlp_params(kp, input_dim, output_dim, hidden_dims)

    out = jax.block_until_ready(vanilla_mlp_forward(x, params))
    ref = reference_forward(x, params)
    assert out.shape == (batch, output_dim)
    assert jnp.allclose(out, ref, atol=1e-2, rtol=1e-2), float(
        jnp.max(jnp.abs(out - ref)))

    # Multi-step grid (pipelined / megacore-shardable), explicit batch tile.
    x2 = jax.random.normal(kx, (64, input_dim), jnp.float32)
    out2 = jax.block_until_ready(vanilla_mlp_forward(x2, params, batch_tile=16))
    ref2 = reference_forward(x2, params)
    assert out2.shape == (64, output_dim)
    assert jnp.allclose(out2, ref2, atol=1e-2, rtol=1e-2), float(
        jnp.max(jnp.abs(out2 - ref2)))

    # Auto-tiling path: should pick >= 2 grid steps for B=64.
    out3 = jax.block_until_ready(vanilla_mlp_forward(x2, params))
    assert out3.shape == (64, output_dim)
    assert jnp.allclose(out3, ref2, atol=1e-2, rtol=1e-2), float(
        jnp.max(jnp.abs(out3 - ref2)))

    print("KERNEL_OK")
</pallas_src>

<mosaic_0001>
module attributes {stable_mosaic.version = 11 : i64} {
  func.func @kernel(%arg0: i32, %arg1: memref<16x16xbf16, #tpu.memory_space<vmem>>, %arg2: memref<16x128xbf16, #tpu.memory_space<vmem>>, %arg3: memref<1x128xf32, #tpu.memory_space<vmem>>, %arg4: memref<128x128xbf16, #tpu.memory_space<vmem>>, %arg5: memref<1x128xf32, #tpu.memory_space<vmem>>, %arg6: memref<128x8xbf16, #tpu.memory_space<vmem>>, %arg7: memref<1x8xf32, #tpu.memory_space<vmem>>, %arg8: memref<16x8xf32, #tpu.memory_space<vmem>>) attributes {dimension_semantics = [#tpu.dimension_semantics<parallel>], iteration_bounds = array<i64: 1>, scalar_prefetch = 0 : i64, scratch_operands = 0 : i64, tpu.core_type = #tpu.core_type<tc>, window_params = [{transform_indices = @transform_0, window_bounds = array<i64: 16, 16>}, {pipeline_mode = #tpu.pipeline_mode<synchronous>, transform_indices = @transform_1, window_bounds = array<i64: 16, 128>}, {pipeline_mode = #tpu.pipeline_mode<synchronous>, transform_indices = @transform_2, window_bounds = array<i64: 1, 128>}, {pipeline_mode = #tpu.pipeline_mode<synchronous>, transform_indices = @transform_3, window_bounds = array<i64: 128, 128>}, {pipeline_mode = #tpu.pipeline_mode<synchronous>, transform_indices = @transform_4, window_bounds = array<i64: 1, 128>}, {pipeline_mode = #tpu.pipeline_mode<synchronous>, transform_indices = @transform_5, window_bounds = array<i64: 128, 8>}, {pipeline_mode = #tpu.pipeline_mode<synchronous>, transform_indices = @transform_6, window_bounds = array<i64: 1, 8>}, {transform_indices = @transform_7, window_bounds = array<i64: 16, 8>}]} {
    %c0 = arith.constant 0 : index
    %c0_0 = arith.constant 0 : index
    %0 = vector.load %arg1[%c0, %c0_0] : memref<16x16xbf16, #tpu.memory_space<vmem>>, vector<16x16xbf16>
    %c0_1 = arith.constant 0 : index
    %c0_2 = arith.constant 0 : index
    %1 = vector.load %arg2[%c0_1, %c0_2] : memref<16x128xbf16, #tpu.memory_space<vmem>>, vector<16x128xbf16>
    %c0_3 = arith.constant 0 : index
    %c0_4 = arith.constant 0 : index
    %2 = vector.load %arg3[%c0_3, %c0_4] : memref<1x128xf32, #tpu.memory_space<vmem>>, vector<1x128xf32>
    %cst = arith.constant dense<0.000000e+00> : vector<16x128xf32>
    %3 = tpu.matmul %0, %1, %cst {dimension_numbers = #tpu.dot_dimension_numbers<[1], [0], [0], [1], [0, 0, 1, 1], [], []>} : vector<16x16xbf16>, vector<16x128xbf16>, vector<16x128xf32> -> vector<16x128xf32>
    %4 = vector.broadcast %2 : vector<1x128xf32> to vector<16x128xf32>
    %5 = arith.addf %3, %4 : vector<16x128xf32>
    %cst_5 = arith.constant 0.000000e+00 : f32
    %6 = vector.broadcast %cst_5 : f32 to vector<16x128xf32>
    %7 = arith.maximumf %5, %6 : vector<16x128xf32>
    %8 = arith.truncf %7 : vector<16x128xf32> to vector<16x128xbf16>
    %c0_6 = arith.constant 0 : index
    %c0_7 = arith.constant 0 : index
    %9 = vector.load %arg4[%c0_6, %c0_7] : memref<128x128xbf16, #tpu.memory_space<vmem>>, vector<128x128xbf16>
    %c0_8 = arith.constant 0 : index
    %c0_9 = arith.constant 0 : index
    %10 = vector.load %arg5[%c0_8, %c0_9] : memref<1x128xf32, #tpu.memory_space<vmem>>, vector<1x128xf32>
    %cst_10 = arith.constant dense<0.000000e+00> : vector<16x128xf32>
    %11 = tpu.matmul %8, %9, %cst_10 {dimension_numbers = #tpu.dot_dimension_numbers<[1], [0], [0], [1], [0, 0, 1, 1], [], []>} : vector<16x128xbf16>, vector<128x128xbf16>, vector<16x128xf32> -> vector<16x128xf32>
    %12 = vector.broadcast %10 : vector<1x128xf32> to vector<16x128xf32>
    %13 = arith.addf %11, %12 : vector<16x128xf32>
    %cst_11 = arith.constant 0.000000e+00 : f32
    %14 = vector.broadcast %cst_11 : f32 to vector<16x128xf32>
    %15 = arith.maximumf %13, %14 : vector<16x128xf32>
    %16 = arith.truncf %15 : vector<16x128xf32> to vector<16x128xbf16>
    %c0_12 = arith.constant 0 : index
    %c0_13 = arith.constant 0 : index
    %17 = vector.load %arg6[%c0_12, %c0_13] : memref<128x8xbf16, #tpu.memory_space<vmem>>, vector<128x8xbf16>
    %c0_14 = arith.constant 0 : index
    %c0_15 = arith.constant 0 : index
    %18 = vector.load %arg7[%c0_14, %c0_15] : memref<1x8xf32, #tpu.memory_space<vmem>>, vector<1x8xf32>
    %cst_16 = arith.constant dense<0.000000e+00> : vector<16x8xf32>
    %19 = tpu.matmul %16, %17, %cst_16 {dimension_numbers = #tpu.dot_dimension_numbers<[1], [0], [0], [1], [0, 0, 1, 1], [], []>} : vector<16x128xbf16>, vector<128x8xbf16>, vector<16x8xf32> -> vector<16x8xf32>
    %20 = vector.broadcast %18 : vector<1x8xf32> to vector<16x8xf32>
    %21 = arith.addf %19, %20 : vector<16x8xf32>
    %c0_17 = arith.constant 0 : index
    %c0_18 = arith.constant 0 : index
    %22 = vector.load %arg8[%c0_17, %c0_18] : memref<16x8xf32, #tpu.memory_space<vmem>>, vector<16x8xf32>
    tpu.vector_store %arg8[%c0_17, %c0_18], %21 {strides = array<i32>} : memref<16x8xf32, #tpu.memory_space<vmem>>, vector<16x8xf32>,
    return
  }
  func.func @transform_0(%arg0: i32) -> (i32, i32) {
    %c0_i32 = arith.constant 0 : i32
    %c0_i32_0 = arith.constant 0 : i32
    return %arg0, %c0_i32 : i32, i32
  }
  func.func @transform_1(%arg0: i32) -> (i32, i32) {
    %c0_i32 = arith.constant 0 : i32
    %c0_i32_0 = arith.constant 0 : i32
    %c0_i32_1 = arith.constant 0 : i32
    return %c0_i32, %c0_i32_0 : i32, i32
  }
  func.func @transform_2(%arg0: i32) -> (i32, i32) {
    %c0_i32 = arith.constant 0 : i32
    %c0_i32_0 = arith.constant 0 : i32
    %c0_i32_1 = arith.constant 0 : i32
    return %c0_i32, %c0_i32_0 : i32, i32
  }
  func.func @transform_3(%arg0: i32) -> (i32, i32) {
    %c0_i32 = arith.constant 0 : i32
    %c0_i32_0 = arith.constant 0 : i32
    %c0_i32_1 = arith.constant 0 : i32
    return %c0_i32, %c0_i32_0 : i32, i32
  }
  func.func @transform_4(%arg0: i32) -> (i32, i32) {
    %c0_i32 = arith.constant 0 : i32
    %c0_i32_0 = arith.constant 0 : i32
    %c0_i32_1 = arith.constant 0 : i32
    return %c0_i32, %c0_i32_0 : i32, i32
  }
  func.func @transform_5(%arg0: i32) -> (i32, i32) {
    %c0_i32 = arith.constant 0 : i32
    %c0_i32_0 = arith.constant 0 : i32
    %c0_i32_1 = arith.constant 0 : i32
    return %c0_i32, %c0_i32_0 : i32, i32
  }
  func.func @transform_6(%arg0: i32) -> (i32, i32) {
    %c0_i32 = arith.constant 0 : i32
    %c0_i32_0 = arith.constant 0 : i32
    %c0_i32_1 = arith.constant 0 : i32
    return %c0_i32, %c0_i32_0 : i32, i32
  }
  func.func @transform_7(%arg0: i32) -> (i32, i32) {
    %c0_i32 = arith.constant 0 : i32
    %c0_i32_0 = arith.constant 0 : i32
    return %arg0, %c0_i32 : i32, i32
  }
}

</mosaic_0001>

<bundles_post_ra>
// kernel: tpu_custom_call.1
= control target key start
LH: loop header
LB: loop body
LE: loop exit
PB: predicated region body
PF: predicated region fallthrough
CT: control target
= control target key end

     0   :  { %12 = vsyncpa [#allocation3], 0  ;;  %s481_s24 = smov [#allocation2]   ;;  %s624_s0 = inlined_call_operand.vmem [shape: bf16[16,16], index: 0, kind: input, shape index: {}]   ;;  %s625_s1 = inlined_call_operand.hbm [shape: bf16[16,128], index: 1, kind: input, shape index: {}]   ;;  %s626_s2 = inlined_call_operand.vmem [shape: f32[1,128], index: 2, kind: input, shape index: {}]   ;;  %s627_s3 = inlined_call_operand.vmem [shape: bf16[128,128], index: 3, kind: input, shape index: {}]   ;;  %s628_s4 = inlined_call_operand.vmem [shape: f32[1,128], index: 4, kind: input, shape index: {}]   ;;  %s629_s5 = inlined_call_operand.vmem [shape: bf16[128,8], index: 5, kind: input, shape index: {}]   ;;  %s630_s6 = inlined_call_operand.vmem [shape: f32[1,8], index: 6, kind: input, shape index: {}]   ;;  %s631_s7 = inlined_call_operand.vmem [shape: f32[16,8], index: 7, kind: output, shape index: {}]  }
   0x1   :  { %s20_s25 = sshll.u32 %s481_s24, 4  ;;  %s457_s28 = scalar_lea.hbm %s625_s1, 128  ;;  %s21_s25 = int_to_ptr.vmem [resolvable:$true] %s20_s25 }
   0x2   :  { %p458_p0 = scmp.ne.s32.totalorder %s625_s1, %s457_s28  ;;  %p461_p1 = scmp.lt.u32.totalorder %s457_s28, %s625_s1 }
   0x4   :  { %p463_p2 = pnand %p461_p1, %p458_p0 }
   0x6   :  { %466 = shalt.err (!%p463_p2)
}
   0x7   :  { %s467_s10 = scalar_lea.vmem %s21_s25, 128  ;;  %p472_p4 = scmp.lt.s32.totalorder %s21_s25, %s21_s25 }
   0x8   :  { %p468_p3 = scmp.ne.s32.totalorder %s21_s25, %s467_s10  ;;  %p473_p5 = scmp.lt.s32.totalorder %s467_s10, %s467_s10 }
   0xa   :  { %p474_p6 = por %p473_p5, %p472_p4 }
   0xc   :  { %p475_p7 = pnand %p474_p6, %p468_p3 }
   0xe   :  { %478 = shalt.err (!%p475_p7)
}
   0xf   :  { %s482_s11 = smov 64   ;;  %s483_s12 = smov 4  }
  0x10   :  { %26 = dma.hbm_to_vmem [thread:$0]  %s625_s1, 128, %s21_s25, [#allocation3], %s482_s11, %s482_s11, %s483_s12  }
  0x11   :  { %479 = dma.done.wait [#allocation3], 128  }
  0x12   :  { %480 = vsyncadd [#allocation3], 4294967168  ;;  %v484_v0 = vmov 0.0   ;;  %vm485_vm0 = vmmov 0   ;;  %v439_v1 = vld [vmem:[#allocation2] sm:$0xff]   ;;  %vm63_vm1 = vcmask 130048  }
  0x13   :  { %388 = vmatprep.subr.bf16.mxu0 %v484_v0  ;;  %390 = vmatprep.mubr.msk.bf16.mxu0 %vm485_vm0, %v484_v0  ;;  %v440_v2 = vld [vmem:[%s624_s0] sm:$0xff]   ;;  %v442_v4 = vld [vmem:[%s627_s3 + $0x8] sm:$0xff]   ;;  %v443_v5 = vld [vmem:[%s627_s3 + $0x10] sm:$0xff]   ;;  %vm338_vm2 = vcmask 64512  }
  0x14   :  { %394 = vmatprep.subr.bf16.mxu1 %v484_v0  ;;  %410 = vmatprep.mubr.msk.bf16.mxu1 %vm485_vm0, %v484_v0  ;;  %v441_v3 = vld [vmem:[%s627_s3] sm:$0xff]   ;;  %v444_v6 = vld [vmem:[%s627_s3 + $0x18] sm:$0xff]   ;;  %v446_v8 = vld [vmem:[%s627_s3 + $0x28] sm:$0xff]  }
  0x15   :  { %389 = vmatpush3.bf16.msra.mxu0 %v439_v1  ;;  %395 = vmatpush3.bf16.msra.mxu1 %v441_v3  ;;  %v445_v7 = vld [vmem:[%s627_s3 + $0x20] sm:$0xff]   ;;  %v447_v9 = vld [vmem:[%s627_s3 + $0x30] sm:$0xff]   ;;  %v448_v10 = vld [vmem:[%s627_s3 + $0x38] sm:$0xff]  }
  0x16   :  { %414 = vmatprep.subr.bf16.mxu0 %v484_v0  ;;  %396 = vmatprep.subr.bf16.mxu1 %v484_v0  ;;  %v449_v11 = vld [vmem:[%s629_s5] sm:$0xff]   ;;  %v450_v12 = vld [vmem:[%s629_s5 + $0x8] sm:$0xff]   ;;  %v451_v13 = vld [vmem:[%s629_s5 + $0x10] sm:$0xff]  }
  0x17   :  { %v452_v14 = vld [vmem:[%s629_s5 + $0x18] sm:$0xff]   ;;  %v453_v15 = vld [vmem:[%s629_s5 + $0x20] sm:$0xff]   ;;  %v454_v16 = vld [vmem:[%s629_s5 + $0x28] sm:$0xff]  }
  0x18   :  { %391 = vmatmul.mubr.msk.bf16.vlgmr.msra.gmra.mrb[0].mxu0 %vm63_vm1, %v440_v2  ;;  %v346_v17 = vld [vmem:[%s626_s2] ss:$0 sm:$0xff]  ;;  %v455_v27 = vld [vmem:[%s629_s5 + $0x30] sm:$0xff]   ;;  %v456_v28 = vld [vmem:[%s629_s5 + $0x38] sm:$0xff]  }
  0x19   :  { %430 = vmatprep.mubr.msk.bf16.mxu0 %vm485_vm0, %v484_v0  ;;  %397 = vmatpush3.bf16.msra.mxu1 %v442_v4  ;;  %v350_v29 = vld [vmem:[%s628_s4] ss:$0 sm:$0xff] }
  0x1a   :  { %398 = vmatprep.subr.bf16.mxu1 %v484_v0  ;;  %415 = vmatpush3.bf16.msra.mxu0 %v449_v11  ;;  %v359_v39 = vld [vmem:[%s630_s6] ss:$0 sm:$0xff] }
  0x1b   :  { %416 = vmatprep.subr.bf16.mxu0 %v484_v0 }
  0x1d   :  { %399 = vmatpush3.bf16.msra.mxu1 %v443_v5 }
  0x1e   :  { %400 = vmatprep.subr.bf16.mxu1 %v484_v0  ;;  %417 = vmatpush3.bf16.msra.mxu0 %v450_v12 }
  0x1f   :  { %418 = vmatprep.subr.bf16.mxu0 %v484_v0 }
  0x21   :  { %401 = vmatpush3.bf16.msra.mxu1 %v444_v6 }
  0x22   :  { %402 = vmatprep.subr.bf16.mxu1 %v484_v0  ;;  %419 = vmatpush3.bf16.msra.mxu0 %v451_v13 }
  0x23   :  { %420 = vmatprep.subr.bf16.mxu0 %v484_v0 }
  0x25   :  { %403 = vmatpush3.bf16.msra.mxu1 %v445_v7 }
  0x26   :  { %404 = vmatprep.subr.bf16.mxu1 %v484_v0  ;;  %421 = vmatpush3.bf16.msra.mxu0 %v452_v14 }
  0x27   :  { %422 = vmatprep.subr.bf16.mxu0 %v484_v0 }
  0x29   :  { %405 = vmatpush3.bf16.msra.mxu1 %v446_v8 }
  0x2a   :  { %406 = vmatprep.subr.bf16.mxu1 %v484_v0  ;;  %423 = vmatpush3.bf16.msra.mxu0 %v453_v15 }
  0x2b   :  { %424 = vmatprep.subr.bf16.mxu0 %v484_v0 }
  0x2d   :  { %407 = vmatpush3.bf16.msra.mxu1 %v447_v9 }
  0x2e   :  { %408 = vmatprep.subr.bf16.mxu1 %v484_v0  ;;  %425 = vmatpush3.bf16.msra.mxu0 %v454_v16 }
  0x2f   :  { %426 = vmatprep.subr.bf16.mxu0 %v484_v0 }
  0x31   :  { %409 = vmatpush3.bf16.msra.mxu1 %v448_v10 }
  0x32   :  { %427 = vmatpush3.bf16.msra.mxu0 %v455_v27 }
  0x33   :  { %428 = vmatprep.subr.bf16.mxu0 %v484_v0 }
  0x36   :  { %429 = vmatpush3.bf16.msra.mxu0 %v456_v28 }
  0xeb   :  { %v101_v18 = vpop.f32.mrb[0].mxu0 }
  0xec   :  { %v102_v19 = vadd.f32 %v346_v17, %v101_v18  ;;  %v392_v20 = vpop.f32.mrb[1].mxu0 }
  0xed   :  { %v104_v21 = vpop.f32.mrb[2].mxu0 }
  0xee   :  { %v105_v22 = vadd.f32 %v346_v17, %v104_v21  ;;  %v393_v23 = vpop.f32.mrb[3].mxu0  ;;  %v108_v24 = vmax.f32 %v102_v19, 0.0 }
  0xf0   :  { %v109_v25 = vmax.f32 %v105_v22, 0.0 }
  0xf2   :  { %v110_v26 = vpack.c.bf16 %v109_v25, %v108_v24 }
  0xf4   :  { %411 = vmatmul.mubr.bf16.vlgmr.msra.gmra.mrb[0].mxu1 %v110_v26 }
 0x1c7   :  { %v216_v30 = vpop.f32.mrb[0].mxu1 }
 0x1c8   :  { %v217_v31 = vadd.f32 %v350_v29, %v216_v30  ;;  %v412_v32 = vpop.f32.mrb[1].mxu1 }
 0x1c9   :  { %v219_v33 = vpop.f32.mrb[2].mxu1 }
 0x1ca   :  { %v220_v34 = vadd.f32 %v350_v29, %v219_v33  ;;  %v413_v35 = vpop.f32.mrb[3].mxu1  ;;  %v223_v36 = vmax.f32 %v217_v31, 0.0 }
 0x1cc   :  { %v224_v37 = vmax.f32 %v220_v34, 0.0 }
 0x1ce   :  { %v225_v38 = vpack.c.bf16 %v224_v37, %v223_v36 }
 0x1d0   :  { %431 = vmatmul.mubr.bf16.vlgmr.msra.gmra.mrb[4].mxu0 %v225_v38 }
 0x2a3   :  { %v331_v40 = vpop.f32.mrb[4].mxu0 }
 0x2a4   :  { %v332_v41 = vadd.f32 %v359_v39, %v331_v40  ;;  %v432_v42 = vpop.f32.mrb[5].mxu0 }
 0x2a5   :  { %v334_v43 = vpop.f32.mrb[6].mxu0 }
 0x2a6   :  { %339 = vst.msk [vmem:[%s631_s7] sm:$0xff] %vm338_vm2, %v332_v41  ;;  %v335_v44 = vadd.f32 %v359_v39, %v334_v43  ;;  %v433_v45 = vpop.f32.mrb[7].mxu0 }
 0x2a8   :  { %340 = vst.msk [vmem:[%s631_s7 + $0x8] sm:$0xff] %vm338_vm2, %v335_v44 }
 0x2a9   :  { %345 = vsyncpa [#allocation3], 1 }

</bundles_post_ra>
